<compile_context>
chip_gen: v5e
topology: v5e:2x2
jax: 0.10.0
libtpu: 0.0.40
codegen_flags: <defaults>
</compile_context>

<pallas_src>
import functools
import math

import jax
import jax.numpy as jnp
from jax import lax
from jax.experimental import pallas as pl
from jax.experimental.pallas import tpu as pltpu

LANE = 128
SUBLANE = 8
EPS = 1e-7

_MAX_BLOCK_ROWS = 16384     # hard cap on rows per block
_ROW_ALIGN = 32             # sublane multiple valid for f32 / bf16 / 8-bit blocks
_F32_TEMPS = 4              # budgeted live f32 block-sized temporaries in the kernel
_MIB = 1024 * 1024


@functools.lru_cache(maxsize=1)
def _tpu_config():
    """Returns (num_tensorcores, scoped_vmem_limit_bytes) for the local TPU."""
    kind = ""
    try:
        kind = jax.devices()[0].device_kind.lower()
    except Exception:
        pass

    vmem_phys = None
    num_cores = None
    try:
        info = pltpu.get_tpu_info()
        for attr in ("vmem_capacity_bytes", "vmem_bytes", "vmem_size_bytes"):
            v = getattr(info, attr, None)
            if isinstance(v, int) and v > 0:
                vmem_phys = v
                break
        for attr in ("num_tensorcores", "tensorcore_count", "num_tensor_cores"):
            v = getattr(info, attr, None)
            if isinstance(v, int) and v > 0:
                num_cores = v
                break
    except Exception:
        pass

    if num_cores is None:
        # Dual-TensorCore chips: v4 / v5p megacore and v7x.  v5e / v6e are single-TC.
        multi = any(t in kind for t in ("v4", "v5p", "v7", "7x"))
        single = any(t in kind for t in ("lite", "v5e", "v6e", "v6 "))
        num_cores = 2 if (multi and not single) else 1
    num_cores = max(1, min(int(num_cores), 2))

    if vmem_phys is None:
        # 128 MiB on v4/v5/v6 generations, 64 MiB on v7x; conservative if unknown.
        vmem_phys = 64 * _MIB if ("v7" in kind or "7x" in kind) else 128 * _MIB
    vmem_limit = max(16 * _MIB, min(vmem_phys // 2, 64 * _MIB))
    return num_cores, vmem_limit


def _choose_block_rows(rows, in_itemsizes, vmem_limit, requested):
    if requested is not None:
        br = max(SUBLANE, min(int(requested), rows))
        br = (br // SUBLANE) * SUBLANE
        return rows if br >= rows else br
    # Double-buffered input blocks + budgeted f32 temporaries per row.
    bytes_per_row = LANE * (2 * sum(in_itemsizes) + 4 * _F32_TEMPS)
    br = int(vmem_limit * 0.8) // bytes_per_row
    br = min(br, _MAX_BLOCK_ROWS, rows)
    if br >= rows:
        return rows
    return max(_ROW_ALIGN, (br // _ROW_ALIGN) * _ROW_ALIGN)


def _make_kernel(block_rows, total_blocks, steps, valid_rows_last,
                 has_weights, needs_tail_mask, needs_skip):
    def kernel(*refs):
        if has_weights:
            yp_ref, yt_ref, w_ref, out_ref = refs
        else:
            yp_ref, yt_ref, out_ref = refs
        c = pl.program_id(0)
        s = pl.program_id(1)

        @pl.when(s == 0)
        def _():
            out_ref[...] = jnp.zeros_like(out_ref)

        def bce_block(mask_tail_rows):
            # Element-wise robust BCE log-likelihood, accumulated in f32.
            yp = jnp.clip(yp_ref[...].astype(jnp.float32), EPS, 1.0 - EPS)
            yt = yt_ref[...].astype(jnp.float32)
            loss = yt * jnp.log(yp) + (1.0 - yt) * jnp.log(1.0 - yp)
            if has_weights:
                loss = w_ref[...].astype(jnp.float32) * loss
            if mask_tail_rows:
                # Only the ragged last block reads past the logical array; drop
                # those rows (any garbage/NaN is discarded by the select).
                row = lax.broadcasted_iota(jnp.int32, loss.shape, 0)
                loss = jnp.where(row < valid_rows_last, loss, 0.0)
            # (block_rows, 128) -> (8, 128) partial sums: pure VPU adds.
            out_ref[...] += loss.reshape(block_rows // SUBLANE, SUBLANE, LANE).sum(axis=0)

        if not needs_tail_mask and not needs_skip:
            # Fast path (aligned sizes, even core split): no masks, no branches.
            bce_block(False)
        else:
            logical = c * steps + s
            plain_limit = total_blocks - 1 if needs_tail_mask else total_blocks

            @pl.when(logical < plain_limit)
            def _():
                bce_block(False)

            if needs_tail_mask:
                @pl.when(logical == total_blocks - 1)
                def _():
                    bce_block(True)
            # logical >= total_blocks (clamped duplicate overshoot block): skip.

    return kernel


def bce_robust_loss(y_pred, y_true, pixel_weights=1.0, *,
                    block_rows=None, num_cores=None):
    """Equivalent of BCERobustLoss().forward(y_pred, y_true, pixel_weights)."""
    y_pred = jnp.asarray(y_pred)
    shape = y_pred.shape
    n = math.prod(shape) if shape else 1

    y_true = jnp.asarray(y_true)
    if y_true.shape != shape:
        # TODO(synk): stream lower-rank broadcastable y_true / pixel_weights
        # without materializing the broadcast (extra HBM pass on large inputs).
        y_true = jnp.broadcast_to(y_true, shape)

    w_is_scalar = jnp.ndim(pixel_weights) == 0
    inputs_nd = [y_pred, y_true]
    if not w_is_scalar:
        w = jnp.asarray(pixel_weights)
        if w.shape != shape:
            w = jnp.broadcast_to(w, shape)
        inputs_nd.append(w)

    # Flatten to a lane-dense (rows, 128) slab.  Reshape of a contiguous array
    # is free; only a < 1024-element zero tail pad is ever added, and
    # allow_input_fusion lets XLA fuse it into the Mosaic call.
    pad = (-n) % (SUBLANE * LANE)
    rows = (n + pad) // LANE            # multiple of 8

    def prep(x):
        x = x.reshape(-1)
        if pad:
            x = jnp.pad(x, ((0, pad),))
        return x.reshape(rows, LANE)

    inputs = [prep(x) for x in inputs_nd]

    num_tc, vmem_limit = _tpu_config()
    if num_cores is not None:
        num_tc = max(1, int(num_cores))

    itemsizes = [x.dtype.itemsize for x in inputs]
    block_rows = _choose_block_rows(rows, itemsizes, vmem_limit, block_rows)

    total_blocks = -(-rows // block_rows)
    steps = -(-total_blocks // num_tc)
    valid_rows_last = rows - (total_blocks - 1) * block_rows
    needs_tail_mask = valid_rows_last != block_rows        # ragged last block
    needs_skip = steps * num_tc != total_blocks            # clamped duplicate block

    def in_index_map(c, s):
        # Overshooting steps clamp to the last block; their compute is skipped.
        return (jnp.minimum(c * steps + s, total_blocks - 1), 0)

    kernel = _make_kernel(block_rows=block_rows, total_blocks=total_blocks,
                          steps=steps, valid_rows_last=valid_rows_last,
                          has_weights=not w_is_scalar,
                          needs_tail_mask=needs_tail_mask, needs_skip=needs_skip)

    grid_spec = pltpu.PrefetchScalarGridSpec(
        num_scalar_prefetch=0,
        grid=(num_tc, steps),
        in_specs=[pl.BlockSpec((block_rows, LANE), in_index_map)] * len(inputs),
        out_specs=pl.BlockSpec((SUBLANE, LANE), lambda c, s: (c, 0)),
    )
    out_shape = jax.ShapeDtypeStruct((num_tc * SUBLANE, LANE), jnp.float32)

    def run(allow_fusion):
        params = dict(dimension_semantics=("parallel", "arbitrary"),
                      vmem_limit_bytes=int(vmem_limit))
        if allow_fusion:
            params["allow_input_fusion"] = [True] * len(inputs)
        return pl.pallas_call(
            kernel, out_shape=out_shape, grid_spec=grid_spec,
            compiler_params=pltpu.CompilerParams(**params),
        )(*inputs)

    try:
        partials = run(True)
    except Exception:          # defensive fallback if input fusion is rejected
        partials = run(False)

    total = jnp.sum(partials)
    if w_is_scalar:
        if pad:
            # Zero-padded tail: yt=0, yp->clip(0)=EPS, each element contributes
            # exactly log(1 - EPS); remove it analytically (no in-kernel mask).
            total = total - jnp.float32(pad) * jnp.log(jnp.float32(1.0) - jnp.float32(EPS))
        mean = total * jnp.asarray(pixel_weights, jnp.float32) / n
    else:
        # Padded tail has pixel_weights == 0, so it contributes nothing.
        mean = total / n
    return -mean


def _reference(y_pred, y_true, pixel_weights=1.0):
    yp = jnp.clip(jnp.asarray(y_pred).astype(jnp.float32), EPS, 1.0 - EPS)
    yt = jnp.asarray(y_true).astype(jnp.float32)
    w = jnp.asarray(pixel_weights).astype(jnp.float32)
    loss = yt * w * jnp.log(yp) + (1.0 - yt) * w * jnp.log(1.0 - yp)
    return (-loss.mean(axis=1).mean(axis=1)).mean()


if __name__ == "__main__":
    key = jax.random.PRNGKey(0)
    ks = jax.random.split(key, 10)

    # Case 1: aligned f32, scalar weight (fast path: no pad, no mask, no skip).
    B, C, H, W = 2, 4, 16, 16
    yp1 = jax.random.uniform(ks[0], (B, C, H, W), dtype=jnp.float32)
    yt1 = (jax.random.uniform(ks[1], (B, C, H, W)) > 0.5).astype(jnp.float32)
    out1 = jax.block_until_ready(bce_robust_loss(yp1, yt1))
    ref1 = _reference(yp1, yt1)
    assert jnp.allclose(out1, ref1, rtol=2e-5, atol=2e-5), (out1, ref1)

    # Case 2: ragged size + full pixel_weights array (weights stream; padded
    # tail auto-zeroed by w=0).
    yp2 = jax.random.uniform(ks[2], (2, 3, 5, 7), dtype=jnp.float32)
    yt2 = (jax.random.uniform(ks[3], (2, 3, 5, 7)) > 0.5).astype(jnp.float32)
    w2 = jax.random.uniform(ks[4], (2, 3, 5, 7), minval=0.0, maxval=2.0)
    out2 = jax.block_until_ready(bce_robust_loss(yp2, yt2, w2))
    ref2 = _reference(yp2, yt2, w2)
    assert jnp.allclose(out2, ref2, rtol=2e-5, atol=2e-5), (out2, ref2)

    # Case 3: ragged size + scalar weight (analytic pad-correction path).
    out3 = jax.block_until_ready(bce_robust_loss(yp2, yt2, 2.0))
    ref3 = _reference(yp2, yt2, 2.0)
    assert jnp.allclose(out3, ref3, rtol=2e-5, atol=2e-5), (out3, ref3)

    # Case 4: multi-block, forced 2-core grid with odd block count (ragged last
    # block + clamped overshoot-skip path), scalar weight != 1.
    yp4 = jax.random.uniform(ks[5], (2, 4, 32, 32), dtype=jnp.float32)
    yt4 = (jax.random.uniform(ks[6], (2, 4, 32, 32)) > 0.5).astype(jnp.float32)
    out4 = jax.block_until_ready(
        bce_robust_loss(yp4, yt4, 0.5, block_rows=24, num_cores=2))
    ref4 = _reference(yp4, yt4, 0.5)
    assert jnp.allclose(out4, ref4, rtol=2e-5, atol=2e-5), (out4, ref4)

    # Case 5: bf16 input streams (half the HBM bytes), f32 accumulation.
    yp5 = jax.random.uniform(ks[7], (B, C, H, W), dtype=jnp.float32).astype(jnp.bfloat16)
    yt5 = (jax.random.uniform(ks[8], (B, C, H, W)) > 0.5).astype(jnp.bfloat16)
    out5 = jax.block_until_ready(bce_robust_loss(yp5, yt5))
    ref5 = _reference(yp5, yt5)
    assert jnp.allclose(out5, ref5, rtol=2e-4, atol=2e-4), (out5, ref5)

    print("KERNEL_OK")
</pallas_src>

<mosaic_0001>
module attributes {stable_mosaic.version = 11 : i64} {
  func.func @kernel(%arg0: i32, %arg1: i32, %arg2: memref<16x128xf32, #tpu.memory_space<vmem>>, %arg3: memref<16x128xf32, #tpu.memory_space<vmem>>, %arg4: memref<8x128xf32, #tpu.memory_space<vmem>>) attributes {dimension_semantics = [#tpu.dimension_semantics<parallel>, #tpu.dimension_semantics<arbitrary>], iteration_bounds = array<i64: 1, 1>, scalar_prefetch = 0 : i64, scratch_operands = 0 : i64, tpu.core_type = #tpu.core_type<tc>, window_params = [{transform_indices = @transform_0, window_bounds = array<i64: 16, 128>}, {transform_indices = @transform_1, window_bounds = array<i64: 16, 128>}, {transform_indices = @transform_2, window_bounds = array<i64: 8, 128>}]} {
    %c0_i32 = arith.constant 0 : i32
    %0 = arith.cmpi eq, %arg1, %c0_i32 : i32
    %1 = arith.extui %0 : i1 to i32
    %c0_i32_0 = arith.constant 0 : i32
    %2 = arith.cmpi ne, %1, %c0_i32_0 : i32
    scf.if %2 {
      %cst_12 = arith.constant 0.000000e+00 : f32
      %23 = vector.broadcast %cst_12 : f32 to vector<8x128xf32>
      %c0_13 = arith.constant 0 : index
      %c0_14 = arith.constant 0 : index
      %24 = vector.load %arg4[%c0_13, %c0_14] : memref<8x128xf32, #tpu.memory_space<vmem>>, vector<8x128xf32>
      tpu.vector_store %arg4[%c0_13, %c0_14], %23 {strides = array<i32>} : memref<8x128xf32, #tpu.memory_space<vmem>>, vector<8x128xf32>,
    } else {
    }
    %c0 = arith.constant 0 : index
    %c0_1 = arith.constant 0 : index
    %3 = vector.load %arg2[%c0, %c0_1] : memref<16x128xf32, #tpu.memory_space<vmem>>, vector<16x128xf32>
    %cst = arith.constant 1.000000e-07 : f32
    %cst_2 = arith.constant 0.99999988 : f32
    %4 = vector.broadcast %cst : f32 to vector<16x128xf32>
    %5 = arith.maximumf %4, %3 : vector<16x128xf32>
    %6 = vector.broadcast %cst_2 : f32 to vector<16x128xf32>
    %7 = arith.minimumf %6, %5 : vector<16x128xf32>
    %c0_3 = arith.constant 0 : index
    %c0_4 = arith.constant 0 : index
    %8 = vector.load %arg3[%c0_3, %c0_4] : memref<16x128xf32, #tpu.memory_space<vmem>>, vector<16x128xf32>
    %9 = math.log %7 : vector<16x128xf32>
    %10 = arith.mulf %8, %9 : vector<16x128xf32>
    %cst_5 = arith.constant 1.000000e+00 : f32
    %11 = vector.broadcast %cst_5 : f32 to vector<16x128xf32>
    %12 = arith.subf %11, %8 : vector<16x128xf32>
    %cst_6 = arith.constant 1.000000e+00 : f32
    %13 = vector.broadcast %cst_6 : f32 to vector<16x128xf32>
    %14 = arith.subf %13, %7 : vector<16x128xf32>
    %15 = math.log %14 : vector<16x128xf32>
    %16 = arith.mulf %12, %15 : vector<16x128xf32>
    %17 = arith.addf %10, %16 : vector<16x128xf32>
    %c0_7 = arith.constant 0 : index
    %c0_8 = arith.constant 0 : index
    %18 = vector.load %arg4[%c0_7, %c0_8] : memref<8x128xf32, #tpu.memory_space<vmem>>, vector<8x128xf32>
    %19 = vector.shape_cast %17 : vector<16x128xf32> to vector<2x8x128xf32>
    %cst_9 = arith.constant dense<0.000000e+00> : vector<8x128xf32>
    %20 = vector.multi_reduction <add>, %19, %cst_9 [0] : vector<2x8x128xf32> to vector<8x128xf32>
    %21 = arith.addf %18, %20 : vector<8x128xf32>
    %c0_10 = arith.constant 0 : index
    %c0_11 = arith.constant 0 : index
    %22 = vector.load %arg4[%c0_10, %c0_11] : memref<8x128xf32, #tpu.memory_space<vmem>>, vector<8x128xf32>
    tpu.vector_store %arg4[%c0_10, %c0_11], %21 {strides = array<i32>} : memref<8x128xf32, #tpu.memory_space<vmem>>, vector<8x128xf32>,
    return
  }
  func.func @transform_0(%arg0: i32, %arg1: i32) -> (i32, i32) {
    %c1_i32 = arith.constant 1 : i32
    %0 = arith.muli %arg0, %c1_i32 : i32
    %1 = arith.addi %0, %arg1 : i32
    %c0_i32 = arith.constant 0 : i32
    %2 = arith.minsi %1, %c0_i32 : i32
    %c0_i32_0 = arith.constant 0 : i32
    %c0_i32_1 = arith.constant 0 : i32
    return %2, %c0_i32_0 : i32, i32
  }
  func.func @transform_1(%arg0: i32, %arg1: i32) -> (i32, i32) {
    %c1_i32 = arith.constant 1 : i32
    %0 = arith.muli %arg0, %c1_i32 : i32
    %1 = arith.addi %0, %arg1 : i32
    %c0_i32 = arith.constant 0 : i32
    %2 = arith.minsi %1, %c0_i32 : i32
    %c0_i32_0 = arith.constant 0 : i32
    %c0_i32_1 = arith.constant 0 : i32
    return %2, %c0_i32_0 : i32, i32
  }
  func.func @transform_2(%arg0: i32, %arg1: i32) -> (i32, i32) {
    %c0_i32 = arith.constant 0 : i32
    %c0_i32_0 = arith.constant 0 : i32
    return %arg0, %c0_i32 : i32, i32
  }
}

module attributes {stable_mosaic.version = 11 : i64} {
  func.func @kernel(%arg0: i32, %arg1: i32, %arg2: memref<16x128xf32, #tpu.memory_space<vmem>>, %arg3: memref<16x128xf32, #tpu.memory_space<vmem>>, %arg4: memref<8x128xf32, #tpu.memory_space<vmem>>) attributes {dimension_semantics = [#tpu.dimension_semantics<parallel>, #tpu.dimension_semantics<arbitrary>], iteration_bounds = array<i64: 1, 1>, scalar_prefetch = 0 : i64, scratch_operands = 0 : i64, tpu.core_type = #tpu.core_type<tc>, window_params = [{transform_indices = @transform_0, window_bounds = array<i64: 16, 128>}, {transform_indices = @transform_1, window_bounds = array<i64: 16, 128>}, {transform_indices = @transform_2, window_bounds = array<i64: 8, 128>}]} {
    %c0_i32 = arith.constant 0 : i32
    %0 = arith.cmpi eq, %arg1, %c0_i32 : i32
    %1 = arith.extui %0 : i1 to i32
    %c0_i32_0 = arith.constant 0 : i32
    %2 = arith.cmpi ne, %1, %c0_i32_0 : i32
    scf.if %2 {
      %cst_12 = arith.constant 0.000000e+00 : f32
      %23 = vector.broadcast %cst_12 : f32 to vector<8x128xf32>
      %c0_13 = arith.constant 0 : index
      %c0_14 = arith.constant 0 : index
      %24 = vector.load %arg4[%c0_13, %c0_14] : memref<8x128xf32, #tpu.memory_space<vmem>>, vector<8x128xf32>
      tpu.vector_store %arg4[%c0_13, %c0_14], %23 {strides = array<i32>} : memref<8x128xf32, #tpu.memory_space<vmem>>, vector<8x128xf32>,
    } else {
    }
    %c0 = arith.constant 0 : index
    %c0_1 = arith.constant 0 : index
    %3 = vector.load %arg2[%c0, %c0_1] : memref<16x128xf32, #tpu.memory_space<vmem>>, vector<16x128xf32>
    %cst = arith.constant 1.000000e-07 : f32
    %cst_2 = arith.constant 0.99999988 : f32
    %4 = vector.broadcast %cst : f32 to vector<16x128xf32>
    %5 = arith.maximumf %4, %3 : vector<16x128xf32>
    %6 = vector.broadcast %cst_2 : f32 to vector<16x128xf32>
    %7 = arith.minimumf %6, %5 : vector<16x128xf32>
    %c0_3 = arith.constant 0 : index
    %c0_4 = arith.constant 0 : index
    %8 = vector.load %arg3[%c0_3, %c0_4] : memref<16x128xf32, #tpu.memory_space<vmem>>, vector<16x128xf32>
    %9 = math.log %7 : vector<16x128xf32>
    %10 = arith.mulf %8, %9 : vector<16x128xf32>
    %cst_5 = arith.constant 1.000000e+00 : f32
    %11 = vector.broadcast %cst_5 : f32 to vector<16x128xf32>
    %12 = arith.subf %11, %8 : vector<16x128xf32>
    %cst_6 = arith.constant 1.000000e+00 : f32
    %13 = vector.broadcast %cst_6 : f32 to vector<16x128xf32>
    %14 = arith.subf %13, %7 : vector<16x128xf32>
    %15 = math.log %14 : vector<16x128xf32>
    %16 = arith.mulf %12, %15 : vector<16x128xf32>
    %17 = arith.addf %10, %16 : vector<16x128xf32>
    %c0_7 = arith.constant 0 : index
    %c0_8 = arith.constant 0 : index
    %18 = vector.load %arg4[%c0_7, %c0_8] : memref<8x128xf32, #tpu.memory_space<vmem>>, vector<8x128xf32>
    %19 = vector.shape_cast %17 : vector<16x128xf32> to vector<2x8x128xf32>
    %cst_9 = arith.constant dense<0.000000e+00> : vector<8x128xf32>
    %20 = vector.multi_reduction <add>, %19, %cst_9 [0] : vector<2x8x128xf32> to vector<8x128xf32>
    %21 = arith.addf %18, %20 : vector<8x128xf32>
    %c0_10 = arith.constant 0 : index
    %c0_11 = arith.constant 0 : index
    %22 = vector.load %arg4[%c0_10, %c0_11] : memref<8x128xf32, #tpu.memory_space<vmem>>, vector<8x128xf32>
    tpu.vector_store %arg4[%c0_10, %c0_11], %21 {strides = array<i32>} : memref<8x128xf32, #tpu.memory_space<vmem>>, vector<8x128xf32>,
    return
  }
  func.func @transform_0(%arg0: i32, %arg1: i32) -> (i32, i32) {
    %c1_i32 = arith.constant 1 : i32
    %0 = arith.muli %arg0, %c1_i32 : i32
    %1 = arith.addi %0, %arg1 : i32
    %c0_i32 = arith.constant 0 : i32
    %2 = arith.minsi %1, %c0_i32 : i32
    %c0_i32_0 = arith.constant 0 : i32
    %c0_i32_1 = arith.constant 0 : i32
    return %2, %c0_i32_0 : i32, i32
  }
  func.func @transform_1(%arg0: i32, %arg1: i32) -> (i32, i32) {
    %c1_i32 = arith.constant 1 : i32
    %0 = arith.muli %arg0, %c1_i32 : i32
    %1 = arith.addi %0, %arg1 : i32
    %c0_i32 = arith.constant 0 : i32
    %2 = arith.minsi %1, %c0_i32 : i32
    %c0_i32_0 = arith.constant 0 : i32
    %c0_i32_1 = arith.constant 0 : i32
    return %2, %c0_i32_0 : i32, i32
  }
  func.func @transform_2(%arg0: i32, %arg1: i32) -> (i32, i32) {
    %c0_i32 = arith.constant 0 : i32
    %c0_i32_0 = arith.constant 0 : i32
    return %arg0, %c0_i32 : i32, i32
  }
}

</mosaic_0001>

<bundles_post_ra>
// kernel: tpu_custom_call.1
= control target key start
LH: loop header
LB: loop body
LE: loop exit
PB: predicated region body
PF: predicated region fallthrough
CT: control target
= control target key end

     0   :  { %7 = vsyncpa [#allocation3], 0  ;;  %s242_s0 = inlined_call_operand.hbm [shape: f32[16,128], index: 0, kind: input, shape index: {}]   ;;  %s243_s1 = inlined_call_operand.hbm [shape: f32[16,128], index: 1, kind: input, shape index: {}]   ;;  %s244_s2 = inlined_call_operand.hbm [shape: f32[8,128], index: 2, kind: output, shape index: {}]  }
   0x1   :  { %8 = vsyncpa [#allocation6], 0 }
   0x2   :  { %9 = vsyncpa [#allocation4], 0  ;;  %s20_s11 = sshll.u32 %s242_s0, 4  ;;  %s213_s12 = smov [#allocation2]   ;;  %s21_s11 = int_to_ptr.hbm [resolvable:$true] %s20_s11 }
   0x3   :  { %s22_s13 = sshll.u32 %s213_s12, 4  ;;  %s39_s16 = sshll.u32 %s243_s1, 4  ;;  %s23_s13 = int_to_ptr.vmem [resolvable:$true] %s22_s13  ;;  %s40_s16 = int_to_ptr.hbm [resolvable:$true] %s39_s16 }
   0x4   :  { %s214_s17 = smov 128   ;;  %s215_s18 = smov 8  }
   0x5   :  { %28 = dma.hbm_to_vmem [thread:$0]  %s21_s11, 256, %s23_s13, [#allocation3], %s214_s17, %s214_s17, %s215_s18  }
   0x6   :  { %s216_s19 = smov [#allocation5]  }
   0x7   :  { %s41_s20 = sshll.u32 %s216_s19, 4  ;;  %s42_s20 = int_to_ptr.vmem [resolvable:$true] %s41_s20 }
   0x8   :  { %47 = dma.hbm_to_vmem [thread:$0]  %s40_s16, 256, %s42_s20, [#allocation6], %s214_s17, %s214_s17, %s215_s18  }
   0x9   :  { %207 = dma.done.wait [#allocation3], 256  }
   0xa   :  { %208 = vsyncadd [#allocation3], 4294967040 }
   0xb   :  { %209 = dma.done.wait [#allocation6], 256  }
   0xc   :  { %210 = vsyncadd [#allocation6], 4294967040  ;;  %v69_v0 = vld [vmem:[#allocation2] sm:$0xff]  ;;  %v70_v1 = vld [vmem:[#allocation2 + $0x8] sm:$0xff]  ;;  %s217_s0 = smov [#allocation7]   ;;  %s106_s23 = sshll.u32 %s244_s2, 4  ;;  %s107_s23 = int_to_ptr.hbm [resolvable:$true] %s106_s23 }
   0xd   :  { %v71_v2 = vmax.f32 %v69_v0, 1e-07  ;;  %v72_v3 = vmax.f32 %v70_v1, 1e-07  ;;  %v75_v8 = vld [vmem:[#allocation5] sm:$0xff]  ;;  %v76_v9 = vld [vmem:[#allocation5 + $0x8] sm:$0xff] }
   0xe   :  { %v83_v13 = vsub.f32 1.0, %v75_v8  ;;  %v84_v16 = vsub.f32 1.0, %v76_v9  ;;  %s104_s1 = sshll.u32 %s217_s0, 4  ;;  %s105_s1 = int_to_ptr.vmem [resolvable:$true] %s104_s1 }
   0xf   :  { %v73_v4 = vmin.f32 %v71_v2, 0.9999999  ;;  %v74_v5 = vmin.f32 %v72_v3, 0.9999999 }
  0x11   :  { %127 = vlog2.f32 %v73_v4  ;;  %v85_v6 = vsub.f32 1.0, %v73_v4  ;;  %v86_v7 = vsub.f32 1.0, %v74_v5 }
  0x12   :  { %129 = vlog2.f32 %v74_v5 }
  0x13   :  { %131 = vlog2.f32 %v85_v6 }
  0x14   :  { %133 = vlog2.f32 %v86_v7 }
  0x17   :  { %v128_v10 = vpop.eup %127 }
  0x18   :  { %v130_v11 = vpop.eup %129  ;;  %v78_v12 = vmul.f32 0.6931472, %v128_v10 }
  0x19   :  { %v132_v14 = vpop.eup %131  ;;  %v80_v15 = vmul.f32 0.6931472, %v130_v11 }
  0x1a   :  { %v134_v17 = vpop.eup %133  ;;  %v81_v18 = vmul.f32 %v78_v12, %v75_v8  ;;  %v88_v19 = vmul.f32 0.6931472, %v132_v14 }
  0x1b   :  { %v82_v20 = vmul.f32 %v80_v15, %v76_v9  ;;  %v90_v21 = vmul.f32 0.6931472, %v134_v17 }
  0x1c   :  { %v91_v22 = vmul.f32 %v88_v19, %v83_v13 }
  0x1d   :  { %v92_v23 = vmul.f32 %v90_v21, %v84_v16 }
  0x1e   :  { %v93_v24 = vadd.f32 %v91_v22, %v81_v18 }
  0x1f   :  { %v94_v25 = vadd.f32 %v92_v23, %v82_v20 }
  0x21   :  { %v96_v26 = vadd.f32 %v94_v25, %v93_v24 }
  0x23   :  { %98 = vst [vmem:[#allocation7] sm:$0xff] %v96_v26 }
  0x24   :  { %109 = dma.vmem_to_hbm [thread:$0]  %s105_s1, 128, %s107_s23, [#allocation4]  }
  0x25   :  { %211 = dma.done.wait [#allocation4], 128  }
  0x26   :  { %212 = vsyncadd [#allocation4], 4294967168 }
  0x27   :  { %114 = vsyncpa [#allocation3], 1 }
  0x28   :  { %115 = vsyncpa [#allocation6], 1 }
  0x29   :  { %116 = vsyncpa [#allocation4], 1 }

// kernel: tpu_custom_call.1
= control target key start
LH: loop header
LB: loop body
LE: loop exit
PB: predicated region body
PF: predicated region fallthrough
CT: control target
= control target key end

     0   :  { %7 = vsyncpa [#allocation3], 0  ;;  %s242_s0 = inlined_call_operand.hbm [shape: f32[16,128], index: 0, kind: input, shape index: {}]   ;;  %s243_s1 = inlined_call_operand.hbm [shape: f32[16,128], index: 1, kind: input, shape index: {}]   ;;  %s244_s2 = inlined_call_operand.hbm [shape: f32[8,128], index: 2, kind: output, shape index: {}]  }
   0x1   :  { %8 = vsyncpa [#allocation6], 0 }
   0x2   :  { %9 = vsyncpa [#allocation4], 0  ;;  %s20_s11 = sshll.u32 %s242_s0, 4  ;;  %s213_s12 = smov [#allocation2]   ;;  %s21_s11 = int_to_ptr.hbm [resolvable:$true] %s20_s11 }
   0x3   :  { %s22_s13 = sshll.u32 %s213_s12, 4  ;;  %s39_s16 = sshll.u32 %s243_s1, 4  ;;  %s23_s13 = int_to_ptr.vmem [resolvable:$true] %s22_s13  ;;  %s40_s16 = int_to_ptr.hbm [resolvable:$true] %s39_s16 }
   0x4   :  { %s214_s17 = smov 128   ;;  %s215_s18 = smov 8  }
   0x5   :  { %28 = dma.hbm_to_vmem [thread:$0]  %s21_s11, 256, %s23_s13, [#allocation3], %s214_s17, %s214_s17, %s215_s18  }
   0x6   :  { %s216_s19 = smov [#allocation5]  }
   0x7   :  { %s41_s20 = sshll.u32 %s216_s19, 4  ;;  %s42_s20 = int_to_ptr.vmem [resolvable:$true] %s41_s20 }
   0x8   :  { %47 = dma.hbm_to_vmem [thread:$0]  %s40_s16, 256, %s42_s20, [#allocation6], %s214_s17, %s214_s17, %s215_s18  }
   0x9   :  { %207 = dma.done.wait [#allocation3], 256  }
   0xa   :  { %208 = vsyncadd [#allocation3], 4294967040 }
   0xb   :  { %209 = dma.done.wait [#allocation6], 256  }
   0xc   :  { %210 = vsyncadd [#allocation6], 4294967040  ;;  %v69_v0 = vld [vmem:[#allocation2] sm:$0xff]  ;;  %v70_v1 = vld [vmem:[#allocation2 + $0x8] sm:$0xff]  ;;  %s217_s0 = smov [#allocation7]   ;;  %s106_s23 = sshll.u32 %s244_s2, 4  ;;  %s107_s23 = int_to_ptr.hbm [resolvable:$true] %s106_s23 }
   0xd   :  { %v71_v2 = vmax.f32 %v69_v0, 1e-07  ;;  %v72_v3 = vmax.f32 %v70_v1, 1e-07  ;;  %v75_v8 = vld [vmem:[#allocation5] sm:$0xff]  ;;  %v76_v9 = vld [vmem:[#allocation5 + $0x8] sm:$0xff] }
   0xe   :  { %v83_v13 = vsub.f32 1.0, %v75_v8  ;;  %v84_v16 = vsub.f32 1.0, %v76_v9  ;;  %s104_s1 = sshll.u32 %s217_s0, 4  ;;  %s105_s1 = int_to_ptr.vmem [resolvable:$true] %s104_s1 }
   0xf   :  { %v73_v4 = vmin.f32 %v71_v2, 0.9999999  ;;  %v74_v5 = vmin.f32 %v72_v3, 0.9999999 }
  0x11   :  { %127 = vlog2.f32 %v73_v4  ;;  %v85_v6 = vsub.f32 1.0, %v73_v4  ;;  %v86_v7 = vsub.f32 1.0, %v74_v5 }
  0x12   :  { %129 = vlog2.f32 %v74_v5 }
  0x13   :  { %131 = vlog2.f32 %v85_v6 }
  0x14   :  { %133 = vlog2.f32 %v86_v7 }
  0x17   :  { %v128_v10 = vpop.eup %127 }
  0x18   :  { %v130_v11 = vpop.eup %129  ;;  %v78_v12 = vmul.f32 0.6931472, %v128_v10 }
  0x19   :  { %v132_v14 = vpop.eup %131  ;;  %v80_v15 = vmul.f32 0.6931472, %v130_v11 }
  0x1a   :  { %v134_v17 = vpop.eup %133  ;;  %v81_v18 = vmul.f32 %v78_v12, %v75_v8  ;;  %v88_v19 = vmul.f32 0.6931472, %v132_v14 }
  0x1b   :  { %v82_v20 = vmul.f32 %v80_v15, %v76_v9  ;;  %v90_v21 = vmul.f32 0.6931472, %v134_v17 }
  0x1c   :  { %v91_v22 = vmul.f32 %v88_v19, %v83_v13 }
  0x1d   :  { %v92_v23 = vmul.f32 %v90_v21, %v84_v16 }
  0x1e   :  { %v93_v24 = vadd.f32 %v91_v22, %v81_v18 }
  0x1f   :  { %v94_v25 = vadd.f32 %v92_v23, %v82_v20 }
  0x21   :  { %v96_v26 = vadd.f32 %v94_v25, %v93_v24 }
  0x23   :  { %98 = vst [vmem:[#allocation7] sm:$0xff] %v96_v26 }
  0x24   :  { %109 = dma.vmem_to_hbm [thread:$0]  %s105_s1, 128, %s107_s23, [#allocation4]  }
  0x25   :  { %211 = dma.done.wait [#allocation4], 128  }
  0x26   :  { %212 = vsyncadd [#allocation4], 4294967168 }
  0x27   :  { %114 = vsyncpa [#allocation3], 1 }
  0x28   :  { %115 = vsyncpa [#allocation6], 1 }
  0x29   :  { %116 = vsyncpa [#allocation4], 1 }

</bundles_post_ra>
